<compile_context>
chip_gen: v7x
topology: tpu7x:2x2x1
jax: 0.10.0
libtpu: 0.0.40
codegen_flags: <defaults>
</compile_context>

<pallas_src>
import functools
import math

import jax
import jax.numpy as jnp
import numpy as np
from jax.experimental import pallas as pl
from jax.experimental.pallas import tpu as pltpu

_MIB = 1024 * 1024


def _round_up(a, b):
    return (a + b - 1) // b * b


def _vmem_budget_bytes():
    """Per-TensorCore VMEM budget used for tile sizing / scoped limits.

    v7x has only 64 MiB per TensorCore and get_tpu_info() may report chip-level
    capacity, so never assume more than 64 MiB (v5e/v6e still reach the HBM roofline
    with tiles that fit well inside that budget)."""
    try:
        cap = int(pltpu.get_tpu_info().vmem_capacity_bytes)
    except Exception:
        cap = 64 * _MIB
    return max(16 * _MIB, min(cap, 64 * _MIB))


def _stage1_tile_bytes(tile_n, c, x_itemsize):
    cp = _round_up(c, 128)
    x_blk = tile_n * cp * x_itemsize            # logits block
    tgt_blk = tile_n * 128 * 4                  # (tile_n, 1) int32 block, lane-padded
    out_blk = 8 * tile_n * 4                    # (2, tile_n) f32 block, sublane-padded
    temps = 4 * tile_n * cp * 4                 # live (T, C) f32 temporaries (x, ez, ...)
    return 2 * (x_blk + tgt_blk + out_blk) + temps   # double-buffered blocks + temps


def _choose_tile_n(c, x_itemsize, budget):
    tile = 2048                                  # >=512 rows is near the HBM roofline
    while tile > 128 and _stage1_tile_bytes(tile, c, x_itemsize) > (budget * 3) // 4:
        tile //= 2
    return tile


# ---------------------------------------------------------------------------
# Stage 1: per-sample statistics (ce, v), tiled over the batch, lane-dense output.
# ---------------------------------------------------------------------------
def _low_stats_kernel(x_ref, tgt_ref, out_ref, *, lamb, inv_n2):
    x = x_ref[...].astype(jnp.float32)            # [T, C]  (bf16 inputs cast after DMA)
    tgt = tgt_ref[...]                            # [T, 1]  int32 (== C on padded rows)
    t, c = x.shape

    # target-selection mask (never materialize a float one-hot product)
    mask = jax.lax.broadcasted_iota(jnp.int32, (t, c), 1) == tgt

    m = jnp.max(x, axis=1, keepdims=True)                              # [T, 1]
    ez = jnp.exp(x - m)                                                # [T, C]
    se = jnp.sum(ez, axis=1, keepdims=True)                            # [T, 1]
    sesq = jnp.sum(ez * ez, axis=1, keepdims=True)                     # [T, 1]
    x_t = jnp.sum(jnp.where(mask, x, 0.0), axis=1, keepdims=True)      # target logit

    # One small XLU transpose moves the per-sample stats into lane-dense (1, T) rows;
    # the remaining per-sample math then runs on ~T/1024 full vregs instead of T/8
    # lane-padded ones, and the final stores are full-width (no masked vst).
    stats = jnp.transpose(jnp.concatenate([m, se, sesq, x_t], axis=1))  # [4, T]
    m_r, se_r, sq_r, xt_r = stats[0:1], stats[1:2], stats[2:3], stats[3:4]

    lse = jnp.log(se_r) + m_r                     # per-sample log-sum-exp
    ce = lse - xt_r                               # per-sample cross entropy
    p_t = jnp.exp(xt_r - lse)                     # softmax prob of the target class
    # ||d(mean CE)/dx_i||^2 = (sum_j p_ij^2 - 2*p_it + 1) / N^2.  Exact divides here:
    # the squared path amplifies approximate-reciprocal error.
    gsq = (sq_r / (se_r * se_r) - 2.0 * p_t + 1.0) * inv_n2
    v = (gsq + lamb) * (1.0 / (2.0 * lamb))

    out_ref[...] = jnp.concatenate([ce, v], axis=0)   # [2, T] lane-dense store


# ---------------------------------------------------------------------------
# Stage 2: simplex-projection (bisection) + class-weighted reduction on dense blocks.
# ---------------------------------------------------------------------------
def _low_reduce_kernel(stats_ref, w_ref, o_ref, *, n_real, bisect_iters):
    ce = stats_ref[0]                             # [R, 128]
    v = stats_ref[1]                              # [R, 128]
    w = w_ref[...]                                # [R, 128] class weight (0 on padding)
    r, l = v.shape
    n_f = float(n_real)

    idx = (jax.lax.broadcasted_iota(jnp.int32, (r, l), 0) * l
           + jax.lax.broadcasted_iota(jnp.int32, (r, l), 1))
    valid = idx < n_real

    big = jnp.float32(3.0e38)
    hi = jnp.max(jnp.where(valid, v, -big), keepdims=True)            # (1,1): f(hi)=0<=N
    lo = jnp.min(jnp.where(valid, v, big), keepdims=True) - n_f       # (1,1): f(lo)>=N
    # Padded entries sit strictly below lo so max(v - tau, 0) == 0 for them always.
    vv = jnp.where(valid, v, lo - 1.0)

    def body(_, carry):
        lo_, hi_ = carry
        mid = 0.5 * (lo_ + hi_)
        s = jnp.sum(jnp.maximum(vv - mid, 0.0), keepdims=True)        # (1,1)
        gt = s > n_f
        return jnp.where(gt, mid, lo_), jnp.where(gt, hi_, mid)

    lo, hi = jax.lax.fori_loop(0, bisect_iters, body, (lo, hi))
    low_w = jnp.maximum(vv - 0.5 * (lo + hi), 0.0)                    # LOW sample weights

    num = jnp.sum(w * ce * low_w, keepdims=True)                      # (1,1)
    den = jnp.sum(w, keepdims=True)                                   # (1,1)
    o_ref[...] = num / den


def low_loss(x, target, class_weight, lamb, bisect_iters=32, tile_n=None):
    """LOWLoss forward (training branch). x: [N, C] logits (f32 or bf16), target: [N]
    int labels in [0, C), class_weight: [C] (BaseLoss.weight), lamb: LOW smoothing."""
    n, c = x.shape
    itemsize = jnp.dtype(x.dtype).itemsize
    budget = _vmem_budget_bytes()

    np0 = _round_up(n, 128)
    if tile_n is None:
        tile_n = _choose_tile_n(c, itemsize, budget)
    # Tiles are multiples of 128 rows (safe for f32/bf16/int8 sublane packing, aligned
    # block offsets); never larger than the padded batch, and at most half of it so the
    # "parallel" grid axis has >= 2 steps (keeps both v7x TensorCores busy).
    tile_n = max(128, _round_up(int(tile_n), 128))
    tile_n = min(tile_n, np0)
    if np0 >= 256:
        tile_n = min(tile_n, max(128, (np0 // 2) // 128 * 128))
    np_pad = _round_up(n, tile_n)

    target = target.astype(jnp.int32)
    # Per-sample class weight via a cheap XLA gather (kept out of the kernel); zero on
    # padded rows so they drop out of both numerator and denominator in stage 2.
    wcls = class_weight.astype(jnp.float32)[target]
    if np_pad != n:
        x = jnp.pad(x, ((0, np_pad - n), (0, 0)))
        target = jnp.pad(target, (0, np_pad - n), constant_values=c)  # empty one-hot rows
        wcls = jnp.pad(wcls, (0, np_pad - n))
    tgt2d = target.reshape(np_pad, 1)

    vmem1 = int(min(budget, max(32 * _MIB,
                                _stage1_tile_bytes(tile_n, c, itemsize) + 8 * _MIB)))
    stats = pl.pallas_call(
        functools.partial(_low_stats_kernel, lamb=float(lamb),
                          inv_n2=1.0 / (float(n) * float(n))),
        grid=(np_pad // tile_n,),
        out_shape=jax.ShapeDtypeStruct((2, np_pad), jnp.float32),     # stacked [ce; v]
        in_specs=[
            pl.BlockSpec((tile_n, c), lambda i: (i, 0)),              # logits tile
            pl.BlockSpec((tile_n, 1), lambda i: (i, 0)),              # labels
        ],
        out_specs=pl.BlockSpec((2, tile_n), lambda i: (0, i)),        # lane-dense output
        compiler_params=pltpu.CompilerParams(
            dimension_semantics=("parallel",),
            vmem_limit_bytes=vmem1),
    )(x, tgt2d)

    # Free row-major relabels: stage 2 consumes dense (rows, 128) blocks.
    rows = np_pad // 128
    stats3 = stats.reshape(2, rows, 128)
    w2 = wcls.reshape(rows, 128)

    vmem2 = int(min(budget, max(16 * _MIB, 40 * np_pad + 4 * _MIB)))
    out = pl.pallas_call(
        functools.partial(_low_reduce_kernel, n_real=int(n),
                          bisect_iters=int(bisect_iters)),
        out_shape=jax.ShapeDtypeStruct((1, 1), jnp.float32),
        in_specs=[pl.BlockSpec(memory_space=pltpu.MemorySpace.VMEM)] * 2,
        out_specs=pl.BlockSpec(memory_space=pltpu.MemorySpace.VMEM),
        compiler_params=pltpu.CompilerParams(vmem_limit_bytes=vmem2),
    )(stats3, w2)
    return out[0, 0]


def low_loss_ref(x, target, class_weight, lamb, bisect_iters=32):
    """Pure-JAX reference using the straightforward (torch-like) formulation."""
    n, c = x.shape
    xf = x.astype(jnp.float32)
    onehot = jax.nn.one_hot(target, c, dtype=jnp.float32)
    logp = jax.nn.log_softmax(xf, axis=1)
    ce = -jnp.sum(onehot * logp, axis=1)
    p = jax.nn.softmax(xf, axis=1)
    grad = (p - onehot) / n
    gsq = jnp.sum(grad * grad, axis=1)
    v = (gsq + lamb) / (2.0 * lamb)
    lo, hi = jnp.min(v) - n, jnp.max(v)
    for _ in range(bisect_iters):
        mid = 0.5 * (lo + hi)
        s = jnp.sum(jnp.maximum(v - mid, 0.0))
        gt = s > n
        lo = jnp.where(gt, mid, lo)
        hi = jnp.where(gt, hi, mid)
    low_w = jnp.maximum(v - 0.5 * (lo + hi), 0.0)
    wcls = class_weight[target]
    return jnp.sum(wcls * ce * low_w) / jnp.sum(wcls)


if __name__ == "__main__":
    # Deterministic "module init": re_weight scheduler, power=1, extra weight=1.
    num_class_list = np.array([100, 50, 20, 10, 200, 5, 80, 40,
                               120, 60, 30, 15, 300, 25, 12, 8], dtype=np.float64)
    no_of_class = len(num_class_list)
    per_cls = 1.0 / num_class_list
    per_cls = np.array([math.pow(w, 1.0) for w in per_cls])
    per_cls = per_cls / np.sum(per_cls) * no_of_class
    class_weight = jnp.asarray(per_cls, dtype=jnp.float32)             # [C]
    lamb = 0.1                                                         # cfg.LOSS.LOW.LAMB

    # Small deterministic inputs: N=320 (3 tiles of 128 incl. a padded tail), C=16.
    key = jax.random.PRNGKey(0)
    kx, kt = jax.random.split(key)
    n, c = 320, no_of_class
    x = jax.random.normal(kx, (n, c), dtype=jnp.float32)
    target = jax.random.randint(kt, (n,), 0, c, dtype=jnp.int32)

    out = low_loss(x, target, class_weight, lamb, tile_n=128)
    out = jax.block_until_ready(out)

    ref = jax.block_until_ready(low_loss_ref(x, target, class_weight, lamb))
    np.testing.assert_allclose(np.asarray(out), np.asarray(ref), rtol=1e-4, atol=1e-6)

    print("KERNEL_OK")
</pallas_src>

<mosaic_0001>
module attributes {stable_mosaic.version = 11 : i64} {
  func.func @_low_stats_kernel(%arg0: i32, %arg1: memref<128x16xf32, #tpu.memory_space<vmem>>, %arg2: memref<128x1xi32, #tpu.memory_space<vmem>>, %arg3: memref<2x128xf32, #tpu.memory_space<vmem>>) attributes {dimension_semantics = [#tpu.dimension_semantics<parallel>], iteration_bounds = array<i64: 3>, scalar_prefetch = 0 : i64, scratch_operands = 0 : i64, tpu.core_type = #tpu.core_type<tc>, window_params = [{transform_indices = @transform_0, window_bounds = array<i64: 128, 16>}, {transform_indices = @transform_1, window_bounds = array<i64: 128, 1>}, {transform_indices = @transform_2, window_bounds = array<i64: 2, 128>}]} {
    %c0 = arith.constant 0 : index
    %c0_0 = arith.constant 0 : index
    %0 = vector.load %arg1[%c0, %c0_0] : memref<128x16xf32, #tpu.memory_space<vmem>>, vector<128x16xf32>
    %c0_1 = arith.constant 0 : index
    %c0_2 = arith.constant 0 : index
    %1 = vector.load %arg2[%c0_1, %c0_2] : memref<128x1xi32, #tpu.memory_space<vmem>>, vector<128x1xi32>
    %2 = tpu.iota {dimensions = array<i32: 1>} : vector<128x16xi32>
    %3 = vector.broadcast %1 : vector<128x1xi32> to vector<128x16xi32>
    %4 = arith.cmpi eq, %2, %3 : vector<128x16xi32>
    %cst = arith.constant dense<0xFF800000> : vector<128xf32>
    %5 = vector.multi_reduction <maximumf>, %0, %cst [1] : vector<128x16xf32> to vector<128xf32>
    %6 = vector.shape_cast %5 : vector<128xf32> to vector<128x1xf32>
    %7 = vector.broadcast %6 : vector<128x1xf32> to vector<128x16xf32>
    %8 = arith.subf %0, %7 : vector<128x16xf32>
    %9 = math.exp %8 : vector<128x16xf32>
    %cst_3 = arith.constant dense<0.000000e+00> : vector<128xf32>
    %10 = vector.multi_reduction <add>, %9, %cst_3 [1] : vector<128x16xf32> to vector<128xf32>
    %11 = vector.shape_cast %10 : vector<128xf32> to vector<128x1xf32>
    %12 = arith.mulf %9, %9 : vector<128x16xf32>
    %cst_4 = arith.constant dense<0.000000e+00> : vector<128xf32>
    %13 = vector.multi_reduction <add>, %12, %cst_4 [1] : vector<128x16xf32> to vector<128xf32>
    %14 = vector.shape_cast %13 : vector<128xf32> to vector<128x1xf32>
    %cst_5 = arith.constant 0.000000e+00 : f32
    %15 = vector.broadcast %cst_5 : f32 to vector<128x16xf32>
    %16 = arith.select %4, %0, %15 : vector<128x16xi1>, vector<128x16xf32>
    %cst_6 = arith.constant dense<0.000000e+00> : vector<128xf32>
    %17 = vector.multi_reduction <add>, %16, %cst_6 [1] : vector<128x16xf32> to vector<128xf32>
    %18 = vector.shape_cast %17 : vector<128xf32> to vector<128x1xf32>
    %19 = tpu.concatenate %6, %11, %14, %18 in 1 : vector<128x1xf32>, vector<128x1xf32>, vector<128x1xf32>, vector<128x1xf32> -> vector<128x4xf32>
    %20 = tpu.transpose %19, [1, 0] : vector<128x4xf32> -> vector<4x128xf32>
    %21 = vector.extract_strided_slice %20 {offsets = [0, 0], sizes = [1, 128], strides = [1, 1]} : vector<4x128xf32> to vector<1x128xf32>
    %22 = vector.extract_strided_slice %20 {offsets = [1, 0], sizes = [1, 128], strides = [1, 1]} : vector<4x128xf32> to vector<1x128xf32>
    %23 = vector.extract_strided_slice %20 {offsets = [2, 0], sizes = [1, 128], strides = [1, 1]} : vector<4x128xf32> to vector<1x128xf32>
    %24 = vector.extract_strided_slice %20 {offsets = [3, 0], sizes = [1, 128], strides = [1, 1]} : vector<4x128xf32> to vector<1x128xf32>
    %25 = math.log %22 : vector<1x128xf32>
    %26 = arith.addf %25, %21 : vector<1x128xf32>
    %27 = arith.subf %26, %24 : vector<1x128xf32>
    %28 = arith.subf %24, %26 : vector<1x128xf32>
    %29 = math.exp %28 : vector<1x128xf32>
    %30 = arith.mulf %22, %22 : vector<1x128xf32>
    %31 = arith.divf %23, %30 : vector<1x128xf32>
    %cst_7 = arith.constant 2.000000e+00 : f32
    %32 = vector.broadcast %cst_7 : f32 to vector<1x128xf32>
    %33 = arith.mulf %32, %29 : vector<1x128xf32>
    %34 = arith.subf %31, %33 : vector<1x128xf32>
    %cst_8 = arith.constant 1.000000e+00 : f32
    %35 = vector.broadcast %cst_8 : f32 to vector<1x128xf32>
    %36 = arith.addf %34, %35 : vector<1x128xf32>
    %cst_9 = arith.constant 9.76562478E-6 : f32
    %37 = vector.broadcast %cst_9 : f32 to vector<1x128xf32>
    %38 = arith.mulf %36, %37 : vector<1x128xf32>
    %cst_10 = arith.constant 1.000000e-01 : f32
    %39 = vector.broadcast %cst_10 : f32 to vector<1x128xf32>
    %40 = arith.addf %38, %39 : vector<1x128xf32>
    %cst_11 = arith.constant 5.000000e+00 : f32
    %41 = vector.broadcast %cst_11 : f32 to vector<1x128xf32>
    %42 = arith.mulf %40, %41 : vector<1x128xf32>
    %43 = tpu.concatenate %27, %42 in 0 : vector<1x128xf32>, vector<1x128xf32> -> vector<2x128xf32>
    %c0_12 = arith.constant 0 : index
    %c0_13 = arith.constant 0 : index
    %44 = vector.load %arg3[%c0_12, %c0_13] : memref<2x128xf32, #tpu.memory_space<vmem>>, vector<2x128xf32>
    tpu.vector_store %arg3[%c0_12, %c0_13], %43 {strides = array<i32>} : memref<2x128xf32, #tpu.memory_space<vmem>>, vector<2x128xf32>,
    return
  }
  func.func @transform_0(%arg0: i32) -> (i32, i32) {
    %c0_i32 = arith.constant 0 : i32
    %c0_i32_0 = arith.constant 0 : i32
    return %arg0, %c0_i32 : i32, i32
  }
  func.func @transform_1(%arg0: i32) -> (i32, i32) {
    %c0_i32 = arith.constant 0 : i32
    %c0_i32_0 = arith.constant 0 : i32
    return %arg0, %c0_i32 : i32, i32
  }
  func.func @transform_2(%arg0: i32) -> (i32, i32) {
    %c0_i32 = arith.constant 0 : i32
    %c0_i32_0 = arith.constant 0 : i32
    return %c0_i32, %arg0 : i32, i32
  }
}

</mosaic_0001>

<bundles_post_ra>
// kernel: tpu_custom_call.1
= control target key start
LH: loop header
LB: loop body
LE: loop exit
PB: predicated region body
PF: predicated region fallthrough
CT: control target
= control target key end

     0   :  { %7 = vsyncpa [#allocation3], 0  ;;  %s1337_s0 = inlined_call_operand.vmem [shape: f32[384,16], index: 0, kind: input, shape index: {}]   ;;  %s1338_s1 = inlined_call_operand.vmem [shape: s32[384,1], index: 1, kind: input, shape index: {}]   ;;  %s1339_s2 = inlined_call_operand.hbm [shape: f32[2,384], index: 2, kind: output, shape index: {}]  }
   0x1   :  { %9 = vsyncpa [#allocation3 + $0x1], 0  ;;  %s918_s9 = smov 0   ;;  %s920_s10 = smov 0  }
   0x2   :  { %s922_s11 = smov 0   ;;  %s924_s12 = smov 0  }
   0x3 LB: > { %s939_s13 = sadd.s32 4294967295, %s899_s12   ;;  %s744_s14 = sadd.s32 4294967294, %s899_s12   ;;  %s899_s12 = sphi %s924_s12, %s1345_s12   ;;  %s895_s11 = sphi %s922_s11, %s1344_s11   ;;  %s891_s10 = sphi %s920_s10, %s1343_s10   ;;  %s887_s9 = sphi %s918_s9, %s1342_s9  }
   0x4   : > { %s943_s15 = sadd.s32 1, %s899_s12   ;;  %s74_s16 = sadd.s32 1, %s895_s11 }
   0x5   : > { %s71_s17 = ssub.s32 %s899_s12, %s943_s15  ;;  %p84_p0 = scmp.ne.s32.totalorder %s895_s11, %s891_s10 }
   0x6   : > { %p72_p1 = scmp.eq.s32.totalorder %s71_s17, 0  ;;  %p85_p2 = scmp.eq.s32.totalorder %s939_s13, 2 }
   0x7   : > { %p90_p3 = scmp.ne.s32.totalorder %s891_s10, %s887_s9  ;;  %p91_p4 = scmp.eq.s32.totalorder %s744_s14, 2 }
   0x8   : > { %s954_s18 = scalar_select %p72_p1, %s895_s11, %s74_s16  }
   0x9   : > { %p956_p5 = por %p85_p2, %p84_p0  ;;  %p960_p6 = por %p91_p4, %p90_p3 }
   0xa   : > { %p747_p7 = scmp.ge.s32.totalorder %s899_s12, 1  ;;  %p127_p8 = scmp.lt.s32.totalorder %s899_s12, 4 }
   0xc   : > { %p128_p9 = pnand %p747_p7, %p127_p8 }
   0xd   : > { %s749_s21 = sshll.u32 (!%p128_p9), %s939_s13, 4  ;;  %v901_v0 = vmov (!%p128_p9), 0   ;;  %vm264_vm0 = vcmask (!%p128_p9), 130048   ;;  %s151_s29 = sand.u32 (!%p128_p9), 1, %s891_s10  }
   0xe   : > { %131 = sbr.rel (%p128_p9) target bundleno = 566 (0x236), region = 28  ;;  %p155_p10 = scmp.lt.s32.totalorder (!%p128_p9), %s749_s21, 47  ;;  %797 = vset.pattern.permute.xlu0 (!%p128_p9), %v901_v0  ;;  %798 = vset.pattern.permute.xlu1 (!%p128_p9), %v901_v0 }
   0xf   : > { %s748_s30 = sshll.u32 (!%p128_p9), %s151_s29, 1  ;;  %s754_s3 = sshll.u32 (!%p128_p9), %s939_s13, 5 }
  0x10   : > { %s153_s4 = scalar_lea.vmem (!%p128_p9), [#allocation2], %s748_s30  ;;  %s1295_s8 = scalar_lea.hbm (!%p128_p9), %s1339_s2, %s754_s3 }
  0x11   : > { %s673_s5 = sshll.u32 (!%p128_p9), %s153_s4, 4  ;;  %s660_s14 = scalar_lea.sflag (!%p128_p9), [#allocation3], %s151_s29  ;;  %s1297_s5 = int_to_ptr.vmem [resolvable:$true] %s673_s5 }
  0x12   : > { %s837_s16 = scalar_lea.vmem (!%p128_p9), %s1297_s5, 32  ;;  %s902_s13 = smov (!%p128_p9), [#allocation2]  }
  0x13   : > { %p838_p11 = scmp.ne.s32.totalorder (!%p128_p9), %s1297_s5, %s837_s16  ;;  %s841_s17 = sshll.u32 (!%p128_p9), %s902_s13, 4  ;;  %s842_s17 = int_to_ptr.vmem [resolvable:$false] %s841_s17 }
  0x14   : > { %p844_p0 = scmp.lt.s32.totalorder (!%p128_p9), %s1297_s5, %s842_s17 }
  0x15   : > { %s1347_s21 = smov (!%p155_p10, %s749_s21), 47  ;;  %p839_p12 = pnand %p838_p11, %p956_p5 }
  0x16   : > { %s750_s22 = sshll.u32 %s1347_s21, 3  ;;  %s843_s21 = scalar_lea.vmem %s842_s17, 64 }
  0x17   : > { %s975_s25 = scalar_lea.vmem %s1337_s0, %s750_s22  ;;  %s1062_s28 = scalar_lea.vmem %s1338_s1, %s750_s22 }
  0x18   : > { %v978_v1 = vld [vmem:[%s975_s25 + $0x10] sm:$0xff]  ;;  %v981_v2 = vld [vmem:[%s975_s25] sm:$0xff]  ;;  %v984_v3 = vld [vmem:[%s975_s25 + $0x18] sm:$0xff]  ;;  %p840_p13 = pneg %p839_p12  ;;  %p845_p1 = scmp.lt.s32.totalorder %s843_s21, %s837_s16 }
  0x19   : > { %v271_v4 = vsel %vm264_vm0, %v978_v1, -inf  ;;  %v265_v5 = vsel %vm264_vm0, %v981_v2, -inf  ;;  %v991_v6 = vld [vmem:[%s975_s25 + $0x8] sm:$0xff]  ;;  %v274_v7 = vsel %vm264_vm0, %v984_v3, -inf  ;;  %v1001_v10 = vld [vmem:[%s975_s25 + $0x20] sm:$0xff]  ;;  %v1008_v13 = vld [vmem:[%s975_s25 + $0x38] sm:$0xff] }
  0x1a   : > { %272 = vmax.xlane.f32.xlu1 %v271_v4  ;;  %266 = vmax.xlane.f32.xlu0 %v265_v5  ;;  %v268_v8 = vsel %vm264_vm0, %v991_v6, -inf  ;;  %v998_v9 = vld [vmem:[%s975_s25 + $0x28] sm:$0xff]  ;;  %v277_v12 = vsel %vm264_vm0, %v1001_v10, -inf  ;;  %v1011_v14 = vld [vmem:[%s975_s25 + $0x30] sm:$0xff]  ;;  %v286_v15 = vsel %vm264_vm0, %v1008_v13, -inf  ;;  %v1021_v18 = vld [vmem:[%s975_s25 + $0x40] sm:$0xff]  ;;  %p846_p2 = por %p845_p1, %p844_p0 }
  0x1b   : > { %v280_v11 = vsel %vm264_vm0, %v998_v9, -inf  ;;  %v283_v16 = vsel %vm264_vm0, %v1011_v14, -inf  ;;  %v1018_v17 = vld [vmem:[%s975_s25 + $0x48] sm:$0xff]  ;;  %v289_v20 = vsel %vm264_vm0, %v1021_v18, -inf  ;;  %v1028_v21 = vld [vmem:[%s975_s25 + $0x58] sm:$0xff]  ;;  %v1031_v22 = vld [vmem:[%s975_s25 + $0x50] sm:$0xff] }
  0x1c   : > { %v292_v19 = vsel %vm264_vm0, %v1018_v17, -inf  ;;  %v298_v23 = vsel %vm264_vm0, %v1028_v21, -inf  ;;  %v295_v24 = vsel %vm264_vm0, %v1031_v22, -inf  ;;  %v1038_v25 = vld [vmem:[%s975_s25 + $0x60] sm:$0xff]  ;;  %v1041_v26 = vld [vmem:[%s975_s25 + $0x70] sm:$0xff]  ;;  %v1048_v29 = vld [vmem:[%s975_s25 + $0x68] sm:$0xff]  ;;  %p847_p3 = pnand %p846_p2, %p840_p13 }
  0x1d   : > { %v301_v27 = vsel %vm264_vm0, %v1038_v25, -inf  ;;  %v307_v28 = vsel %vm264_vm0, %v1041_v26, -inf  ;;  %v304_v30 = vsel %vm264_vm0, %v1048_v29, -inf  ;;  %v1053_v31 = vld [vmem:[%s975_s25 + $0x78] sm:$0xff]  ;;  %v182_v33 = vld [vmem:[%s1062_s28] sm:$0xff]  ;;  %v183_v34 = vld [vmem:[%s1062_s28 + $0x8] sm:$0xff] }
  0x1e   : > { %275 = vmax.xlane.f32.xlu1 %v274_v7  ;;  %269 = vmax.xlane.f32.xlu0 %v268_v8  ;;  %v310_v32 = vsel %vm264_vm0, %v1053_v31, -inf  ;;  %v184_v35 = vld [vmem:[%s1062_s28 + $0x10] sm:$0xff]  ;;  %v185_v36 = vld [vmem:[%s1062_s28 + $0x18] sm:$0xff]  ;;  %v186_v37 = vld [vmem:[%s1062_s28 + $0x20] sm:$0xff] }
  0x1f   : > { %v190_v38 = vld [vmem:[%s1062_s28 + $0x40] sm:$0xff]  ;;  %v187_v39 = vld [vmem:[%s1062_s28 + $0x28] sm:$0xff]  ;;  %v188_v41 = vld [vmem:[%s1062_s28 + $0x30] sm:$0xff] }
  0x20   : > { %v195_v40 = vld [vmem:[%s1062_s28 + $0x68] sm:$0xff]  ;;  %v197_v42 = vld [vmem:[%s1062_s28 + $0x78] sm:$0xff]  ;;  %v192_v45 = vld [vmem:[%s1062_s28 + $0x50] sm:$0xff] }
  0x21   : > { %v189_v43 = vld [vmem:[%s1062_s28 + $0x38] sm:$0xff]  ;;  %v191_v44 = vld [vmem:[%s1062_s28 + $0x48] sm:$0xff]  ;;  %v194_v47 = vld [vmem:[%s1062_s28 + $0x60] sm:$0xff] }
  0x22   : > { %281 = vmax.xlane.f32.xlu1 %v280_v11  ;;  %278 = vmax.xlane.f32.xlu0 %v277_v12  ;;  %v193_v46 = vld [vmem:[%s1062_s28 + $0x58] sm:$0xff]  ;;  %v196_v48 = vld [vmem:[%s1062_s28 + $0x70] sm:$0xff] }
  0x26   : > { %287 = vmax.xlane.f32.xlu1 %v286_v15  ;;  %284 = vmax.xlane.f32.xlu0 %v283_v16 }
  0x2a   : > { %293 = vmax.xlane.f32.xlu1 %v292_v19  ;;  %290 = vmax.xlane.f32.xlu0 %v289_v20 }
  0x2e   : > { %299 = vmax.xlane.f32.xlu1 %v298_v23  ;;  %296 = vmax.xlane.f32.xlu0 %v295_v24 }
  0x32   : > { %302 = vmax.xlane.f32.xlu1 %v301_v27  ;;  %308 = vmax.xlane.f32.xlu0 %v307_v28  ;;  %v198_v27 = vlaneseq }
  0x36   : > { %305 = vmax.xlane.f32.xlu1 %v304_v30 }
  0x3a   : > { %311 = vmax.xlane.f32.xlu1 %v310_v32 }
  0x48   : > { %201 = vperm.xlu0 %797, %v182_v33   ;;  %v1122_v33 = vand.u32 127, %v198_v27 }
  0x4b   : > { %204 = vperm.xlu1 %798, %v183_v34  }
  0x4c   : > { %207 = vperm.xlu0 %797, %v184_v35  }
  0x4f   : > { %210 = vperm.xlu1 %798, %v185_v36  }
  0x50   : > { %213 = vperm.xlu0 %797, %v186_v37  }
  0x53   : > { %225 = vperm.xlu1 %798, %v190_v38  }
  0x54   : > { %216 = vperm.xlu0 %797, %v187_v39  }
  0x57   : > { %240 = vperm.xlu1 %798, %v195_v40  }
  0x58   : > { %219 = vperm.xlu0 %797, %v188_v41  }
  0x5b   : > { %246 = vperm.xlu1 %798, %v197_v42  }
  0x5c   : > { %222 = vperm.xlu0 %797, %v189_v43  }
  0x60   : > { %228 = vperm.xlu0 %797, %v191_v44  }
  0x64   : > { %231 = vperm.xlu0 %797, %v192_v45  }
  0x68   : > { %234 = vperm.xlu0 %797, %v193_v46  }
  0x6c   : > { %237 = vperm.xlu0 %797, %v194_v47  }
  0x70   : > { %243 = vperm.xlu0 %797, %v196_v48  }
  0xa7   : > { %v1080_v49 = vpop.xlane.xlu1 %272  ;;  %v1082_v50 = vpop.xlane.xlu0 %266 }
  0xa8   : > { %v313_v51 = vsub.f32 %v981_v2, %v1082_v50  ;;  %v315_v4 = vsub.f32 %v978_v1, %v1080_v49 }
  0xaa   : > { %v329_v52 = vmul.f32 1.442695, %v313_v51  ;;  %v333_v15 = vmul.f32 1.442695, %v315_v4 }
  0xab   : > { %v1086_v53 = vpop.xlane.xlu1 %275  ;;  %v1088_v54 = vpop.xlane.xlu0 %269 }
  0xac   : > { %v314_v55 = vsub.f32 %v991_v6, %v1088_v54  ;;  %799 = vpow2.f32 %v329_v52  ;;  %v316_v16 = vsub.f32 %v984_v3, %v1086_v53 }
  0xae   : > { %v331_v56 = vmul.f32 1.442695, %v314_v55  ;;  %v335_v28 = vmul.f32 1.442695, %v316_v16 }
  0xaf   : > { %v1092_v57 = vpop.xlane.xlu1 %281  ;;  %v1094_v58 = vpop.xlane.xlu0 %278 }
  0xb0   : > { %801 = vpow2.f32 %v331_v56  ;;  %v317_v34 = vsub.f32 %v1001_v10, %v1094_v58  ;;  %v318_v37 = vsub.f32 %v998_v9, %v1092_v57 }
  0xb1   : > { %803 = vpow2.f32 %v333_v15 }
  0xb2   : > { %805 = vpow2.f32 %v335_v28  ;;  %v337_v38 = vmul.f32 1.442695, %v317_v34  ;;  %v339_v43 = vmul.f32 1.442695, %v318_v37 }
  0xb3   : > { %v1096_v59 = vpop.xlane.xlu1 %287  ;;  %v1098_v60 = vpop.xlane.xlu0 %284 }
  0xb4   : > { %807 = vpow2.f32 %v337_v38 }
  0xb5   : > { %809 = vpow2.f32 %v339_v43 }
  0xb6   : > { %v800_v61 = vpop.eup %799 }
  0xb7   : > { %v1100_v62 = vpop.xlane.xlu1 %293  ;;  %v1102_v63 = vpop.xlane.xlu0 %290  ;;  %v361_v0 = vsel %vm264_vm0, %v800_v61, 0.0  ;;  %v409_v5 = vmul.f32 %v800_v61, %v800_v61 }
  0xb8   : > { %362 = vadd.xlane.f32.xlu0 %v361_v0  ;;  %v320_v0 = vsub.f32 %v1008_v13, %v1096_v59  ;;  %v321_v28 = vsub.f32 %v1021_v18, %v1102_v63 }
  0xb9   : > { %v425_v8 = vsel %vm264_vm0, %v409_v5, 0.0 }
  0xba   : > { %v802_v7 = vpop.eup %801  ;;  %426 = vadd.xlane.f32.xlu1 %v425_v8  ;;  %v343_v16 = vmul.f32 1.442695, %v320_v0 }
  0xbb   : > { %v1108_v11 = vpop.xlane.xlu1 %299  ;;  %v364_v12 = vsel %vm264_vm0, %v802_v7, 0.0  ;;  %v1113_v19 = vpop.xlane.xlu0 %296  ;;  %v410_v20 = vmul.f32 %v802_v7, %v802_v7 }
  0xbc   : > { %365 = vadd.xlane.f32.xlu0 %v364_v12  ;;  %v804_v41 = vpop.eup %803 }
  0xbd   : > { %v428_v23 = vsel %vm264_vm0, %v410_v20, 0.0  ;;  %v367_v47 = vsel %vm264_vm0, %v804_v41, 0.0  ;;  %v411_v48 = vmul.f32 %v804_v41, %v804_v41  ;;  %v806_v51 = vpop.eup %805 }
  0xbe   : > { %429 = vadd.xlane.f32.xlu1 %v428_v23  ;;  %v370_v55 = vsel %vm264_vm0, %v806_v51, 0.0  ;;  %v808_v8 = vpop.eup %807 }
  0xbf   : > { %v1116_v24 = vpop.xlane.xlu1 %302  ;;  %v1118_v30 = vpop.xlane.xlu0 %308  ;;  %v431_v56 = vsel %vm264_vm0, %v411_v48, 0.0  ;;  %v373_v20 = vsel %vm264_vm0, %v808_v8, 0.0  ;;  %v413_v23 = vmul.f32 %v808_v8, %v808_v8 }
  0xc0   : > { %v810_v27 = vpop.eup %809 }
  0xc1   : > { %v414_v37 = vmul.f32 %v810_v27, %v810_v27 }
  0xc3   : > { %v1120_v32 = vpop.xlane.xlu1 %305  ;;  %v440_v41 = vsel %vm264_vm0, %v414_v37, 0.0 }
  0xc4   : > { %v326_v37 = vsub.f32 %v1048_v29, %v1120_v32 }
  0xc7   : > { %v1126_v35 = vpop.xlane.xlu1 %311  ;;  %v202_v36 = vpop.permute.xlu0 %201 }
  0xc8   : > { %vm248_vm1 = vcmp.eq.s32.totalorder %v1122_v33, %v202_v36  ;;  %v376_v36 = vsel %vm264_vm0, %v810_v27, 0.0 }
  0xc9   : > { %v473_v39 = vsel %vm248_vm1, %v981_v2, 0.0  ;;  %v319_v2 = vsub.f32 %v1011_v14, %v1098_v60 }
  0xca   : > { %v489_v40 = vsel %vm264_vm0, %v473_v39, 0.0  ;;  %v322_v39 = vsub.f32 %v1018_v17, %v1100_v62 }
  0xcb   : > { %v205_v42 = vpop.permute.xlu1 %204  ;;  %490 = vadd.xlane.f32.xlu0 %v489_v40  ;;  %v208_v44 = vpop.permute.xlu0 %207  ;;  %v341_v4 = vmul.f32 1.442695, %v319_v2  ;;  %v345_v40 = vmul.f32 1.442695, %v321_v28  ;;  %v323_v2 = vsub.f32 %v1031_v22, %v1113_v19 }
  0xcc   : > { %vm249_vm2 = vcmp.eq.s32.totalorder %v1122_v33, %v205_v42  ;;  %vm250_vm3 = vcmp.eq.s32.totalorder %v1122_v33, %v208_v44 }
  0xcd   : > { %v474_v45 = vsel %vm249_vm2, %v991_v6, 0.0  ;;  %v412_v6 = vmul.f32 %v806_v51, %v806_v51  ;;  %v475_v61 = vsel %vm250_vm3, %v978_v1, 0.0  ;;  %811 = vpow2.f32 %v341_v4 }
  0xce   : > { %v492_v46 = vsel %vm264_vm0, %v474_v45, 0.0  ;;  %v495_v7 = vsel %vm264_vm0, %v475_v61, 0.0  ;;  %813 = vpow2.f32 %v343_v16  ;;  %v324_v61 = vsub.f32 %v1028_v21, %v1108_v11 }
  0xcf   : > { %493 = vadd.xlane.f32.xlu1 %v492_v46  ;;  %368 = vadd.xlane.f32.xlu0 %v367_v47  ;;  %v211_v52 = vpop.permute.xlu1 %210  ;;  %v434_v5 = vsel %vm264_vm0, %v412_v6, 0.0  ;;  %v214_v12 = vpop.permute.xlu0 %213  ;;  %v347_v46 = vmul.f32 1.442695, %v322_v39  ;;  %815 = vpow2.f32 %v345_v40  ;;  %v349_v0 = vmul.f32 1.442695, %v323_v2 }
  0xd0   : > { %vm251_vm4 = vcmp.eq.s32.totalorder %v1122_v33, %v211_v52  ;;  %vm252_vm5 = vcmp.eq.s32.totalorder %v1122_v33, %v214_v12  ;;  %v351_v12 = vmul.f32 1.442695, %v324_v61  ;;  %vm537_vm2 = vcmask 7168  }
  0xd1   : > { %v476_v15 = vsel %vm251_vm4, %v984_v3, 0.0  ;;  %v437_v3 = vsel %vm264_vm0, %v413_v23, 0.0  ;;  %v477_v38 = vsel %vm252_vm5, %v1001_v10, 0.0  ;;  %817 = vpow2.f32 %v347_v46 }
  0xd2   : > { %v498_v1 = vsel %vm264_vm0, %v476_v15, 0.0  ;;  %v501_v42 = vsel %vm264_vm0, %v477_v38, 0.0  ;;  %819 = vpow2.f32 %v349_v0  ;;  %v325_v23 = vsub.f32 %v1038_v25, %v1116_v24 }
  0xd3   : > { %371 = vadd.xlane.f32.xlu1 %v370_v55  ;;  %432 = vadd.xlane.f32.xlu0 %v431_v56  ;;  %v217_v34 = vpop.permute.xlu0 %216  ;;  %v226_v15 = vpop.permute.xlu1 %225  ;;  %821 = vpow2.f32 %v351_v12  ;;  %vm554_vm3 = vcmask 15360   ;;  %vm571_vm4 = vcmask 23552  }
  0xd4   : > { %vm253_vm6 = vcmp.eq.s32.totalorder %v1122_v33, %v217_v34  ;;  %vm256_vm9 = vcmp.eq.s32.totalorder %v1122_v33, %v226_v15 }
  0xd5   : > { %v478_v45 = vsel %vm253_vm6, %v998_v9, 0.0 }
  0xd6   : > { %v504_v47 = vsel %vm264_vm0, %v478_v45, 0.0 }
  0xd7   : > { %435 = vadd.xlane.f32.xlu1 %v434_v5  ;;  %496 = vadd.xlane.f32.xlu0 %v495_v7  ;;  %v812_v43 = vpop.eup %811  ;;  %v220_v44 = vpop.permute.xlu0 %219 }
  0xd8   : > { %v379_v10 = vsel %vm264_vm0, %v812_v43, 0.0  ;;  %v415_v48 = vmul.f32 %v812_v43, %v812_v43  ;;  %v814_v51 = vpop.eup %813  ;;  %vm254_vm7 = vcmp.eq.s32.totalorder %v1122_v33, %v220_v44  ;;  %v355_v43 = vmul.f32 1.442695, %v326_v37  ;;  %v241_v12 = vpop.permute.xlu1 %240 }
  0xd9   : > { %v382_v9 = vsel %vm264_vm0, %v814_v51, 0.0  ;;  %v416_v56 = vmul.f32 %v814_v51, %v814_v51  ;;  %v479_v6 = vsel %vm254_vm7, %v1011_v14, 0.0  ;;  %v816_v7 = vpop.eup %815  ;;  %vm261_vm14 = vcmp.eq.s32.totalorder %v1122_v33, %v241_v12 }
  0xda   : > { %v443_v55 = vsel %vm264_vm0, %v415_v48, 0.0  ;;  %v507_v5 = vsel %vm264_vm0, %v479_v6, 0.0  ;;  %v385_v14 = vsel %vm264_vm0, %v816_v7, 0.0 }
  0xdb   : > { %499 = vadd.xlane.f32.xlu1 %v498_v1  ;;  %374 = vadd.xlane.f32.xlu0 %v373_v20  ;;  %v223_v52 = vpop.permute.xlu0 %222  ;;  %v446_v4 = vsel %vm264_vm0, %v416_v56, 0.0  ;;  %v417_v1 = vmul.f32 %v816_v7, %v816_v7  ;;  %v818_v20 = vpop.eup %817 }
  0xdc   : > { %vm255_vm8 = vcmp.eq.s32.totalorder %v1122_v33, %v223_v52  ;;  %v388_v28 = vsel %vm264_vm0, %v818_v20, 0.0  ;;  %v418_v34 = vmul.f32 %v818_v20, %v818_v20  ;;  %v820_v40 = vpop.eup %819 }
  0xdd   : > { %v480_v8 = vsel %vm255_vm8, %v1008_v13, 0.0  ;;  %v449_v13 = vsel %vm264_vm0, %v417_v1, 0.0  ;;  %v419_v45 = vmul.f32 %v820_v40, %v820_v40  ;;  %v822_v46 = vpop.eup %821 }
  0xde   : > { %v510_v16 = vsel %vm264_vm0, %v480_v8, 0.0  ;;  %v452_v39 = vsel %vm264_vm0, %v418_v34, 0.0  ;;  %v420_v51 = vmul.f32 %v822_v46, %v822_v46 }
  0xdf   : > { %377 = vadd.xlane.f32.xlu1 %v376_v36  ;;  %438 = vadd.xlane.f32.xlu0 %v437_v3  ;;  %v229_v27 = vpop.permute.xlu0 %228  ;;  %v481_v36 = vsel %vm256_vm9, %v1021_v18, 0.0  ;;  %v353_v3 = vmul.f32 1.442695, %v325_v23  ;;  %v391_v18 = vsel %vm264_vm0, %v820_v40, 0.0  ;;  %v455_v48 = vsel %vm264_vm0, %v419_v45, 0.0 }
  0xe0   : > { %vm257_vm10 = vcmp.eq.s32.totalorder %v1122_v33, %v229_v27  ;;  %v513_v38 = vsel %vm264_vm0, %v481_v36, 0.0  ;;  %v486_v27 = vsel %vm261_vm14, %v1048_v29, 0.0 }
  0xe1   : > { %823 = vpow2.f32 %v353_v3 }
  0xe2   : > { %825 = vpow2.f32 %v355_v43 }
  0xe3   : > { %441 = vadd.xlane.f32.xlu1 %v440_v41  ;;  %502 = vadd.xlane.f32.xlu0 %v501_v42  ;;  %v232_v41 = vpop.permute.xlu0 %231  ;;  %v482_v42 = vsel %vm257_vm10, %v1018_v17, 0.0  ;;  %v394_v17 = vsel %vm264_vm0, %v822_v46, 0.0 }
  0xe4   : > { %v516_v44 = vsel %vm264_vm0, %v482_v42, 0.0  ;;  %vm258_vm11 = vcmp.eq.s32.totalorder %v1122_v33, %v232_v41 }
  0xe5   : > { %v483_v2 = vsel %vm258_vm11, %v1031_v22, 0.0 }
  0xe6   : > { %v519_v56 = vsel %vm264_vm0, %v483_v2, 0.0 }
  0xe7   : > { %380 = vadd.xlane.f32.xlu0 %v379_v10  ;;  %505 = vadd.xlane.f32.xlu1 %v504_v47  ;;  %v327_v10 = vsub.f32 %v1041_v26, %v1118_v30  ;;  %v235_v47 = vpop.permute.xlu0 %234 }
  0xe8   : > { %vm259_vm12 = vcmp.eq.s32.totalorder %v1122_v33, %v235_v47 }
  0xe9   : > { %v357_v52 = vmul.f32 1.442695, %v327_v10  ;;  %v484_v61 = vsel %vm259_vm12, %v1028_v21, 0.0 }
  0xeb   : > { %444 = vadd.xlane.f32.xlu0 %v443_v55  ;;  %383 = vadd.xlane.f32.xlu1 %v382_v9  ;;  %v328_v55 = vsub.f32 %v1053_v31, %v1126_v35  ;;  %v458_v9 = vsel %vm264_vm0, %v420_v51, 0.0  ;;  %v824_v6 = vpop.eup %823  ;;  %827 = vpow2.f32 %v357_v52 }
  0xec   : > { %v397_v22 = vsel %vm264_vm0, %v824_v6, 0.0  ;;  %v421_v7 = vmul.f32 %v824_v6, %v824_v6  ;;  %v826_v8 = vpop.eup %825 }
  0xed   : > { %v359_v0 = vmul.f32 1.442695, %v328_v55  ;;  %v422_v21 = vmul.f32 %v826_v8, %v826_v8 }
  0xee   : > { %v461_v15 = vsel %vm264_vm0, %v421_v7, 0.0 }
  0xef   : > { %447 = vadd.xlane.f32.xlu1 %v446_v4  ;;  %508 = vadd.xlane.f32.xlu0 %v507_v5  ;;  %v238_v4 = vpop.permute.xlu0 %237  ;;  %v522_v5 = vsel %vm264_vm0, %v484_v61, 0.0  ;;  %829 = vpow2.f32 %v359_v0  ;;  %v464_v1 = vsel %vm264_vm0, %v422_v21, 0.0 }
  0xf0   : > { %vm260_vm13 = vcmp.eq.s32.totalorder %v1122_v33, %v238_v4 }
  0xf3   : > { %386 = vadd.xlane.f32.xlu0 %v385_v14  ;;  %511 = vadd.xlane.f32.xlu1 %v510_v16  ;;  %v400_v14 = vsel %vm264_vm0, %v826_v8, 0.0  ;;  %v485_v16 = vsel %vm260_vm13, %v1038_v25, 0.0  ;;  %v247_v25 = vpop.permute.xlu1 %246 }
  0xf4   : > { %v525_v20 = vsel %vm264_vm0, %v485_v16, 0.0  ;;  %vm263_vm1 = vcmp.eq.s32.totalorder %v1122_v33, %v247_v25 }
  0xf5   : > { %v828_v23 = vpop.eup %827  ;;  %v488_v42 = vsel %vm263_vm1, %v1053_v31, 0.0 }
  0xf6   : > { %v403_v34 = vsel %vm264_vm0, %v828_v23, 0.0  ;;  %v423_v36 = vmul.f32 %v828_v23, %v828_v23  ;;  %v534_v43 = vsel %vm264_vm0, %v488_v42, 0.0 }
  0xf7   : > { %450 = vadd.xlane.f32.xlu0 %v449_v13  ;;  %389 = vadd.xlane.f32.xlu1 %v388_v28  ;;  %v244_v13 = vpop.permute.xlu0 %243  ;;  %v528_v28 = vsel %vm264_vm0, %v486_v27, 0.0 }
  0xf8   : > { %vm262_vm15 = vcmp.eq.s32.totalorder %v1122_v33, %v244_v13 }
  0xf9   : > { %v830_v3 = vpop.eup %829  ;;  %v487_v29 = vsel %vm262_vm15, %v1041_v26, 0.0 }
  0xfa   : > { %v406_v37 = vsel %vm264_vm0, %v830_v3, 0.0  ;;  %v531_v41 = vsel %vm264_vm0, %v487_v29, 0.0 }
  0xfb   : > { %514 = vadd.xlane.f32.xlu0 %v513_v38  ;;  %453 = vadd.xlane.f32.xlu1 %v452_v39  ;;  %v467_v38 = vsel %vm264_vm0, %v423_v36, 0.0  ;;  %v424_v39 = vmul.f32 %v830_v3, %v830_v3 }
  0xfd   : > { %v470_v40 = vsel %vm264_vm0, %v424_v39, 0.0  ;;  %vm656_vm0 = vcmask 1040384  }
  0xff   : > { %392 = vadd.xlane.f32.xlu0 %v391_v18  ;;  %517 = vadd.xlane.f32.xlu1 %v516_v44 }
 0x103   : > { %456 = vadd.xlane.f32.xlu0 %v455_v48  ;;  %395 = vadd.xlane.f32.xlu1 %v394_v17 }
 0x107   : > { %459 = vadd.xlane.f32.xlu1 %v458_v9  ;;  %520 = vadd.xlane.f32.xlu0 %v519_v56 }
 0x10b   : > { %398 = vadd.xlane.f32.xlu0 %v397_v22  ;;  %523 = vadd.xlane.f32.xlu1 %v522_v5 }
 0x10f   : > { %462 = vadd.xlane.f32.xlu0 %v461_v15  ;;  %401 = vadd.xlane.f32.xlu1 %v400_v14 }
 0x113   : > { %465 = vadd.xlane.f32.xlu1 %v464_v1  ;;  %526 = vadd.xlane.f32.xlu0 %v525_v20 }
 0x117   : > { %529 = vadd.xlane.f32.xlu1 %v528_v28  ;;  %404 = vadd.xlane.f32.xlu0 %v403_v34 }
 0x11b   : > { %407 = vadd.xlane.f32.xlu1 %v406_v37  ;;  %468 = vadd.xlane.f32.xlu0 %v467_v38 }
 0x11f   : > { %471 = vadd.xlane.f32.xlu1 %v470_v40  ;;  %532 = vadd.xlane.f32.xlu0 %v531_v41 }
 0x123   : > { %535 = vadd.xlane.f32.xlu0 %v534_v43 }
 0x145   : > { %v363_v18 = vpop.xlane.xlu0 %362 }
 0x146   : > { %v538_v26 = vsel %vm537_vm2, %v1082_v50, %v363_v18 }
 0x147   : > { %v427_v44 = vpop.xlane.xlu1 %426 }
 0x148   : > { %v555_v33 = vsel %vm554_vm3, %v538_v26, %v427_v44 }
 0x149   : > { %v366_v45 = vpop.xlane.xlu0 %365 }
 0x14a   : > { %v539_v47 = vsel %vm537_vm2, %v1088_v54, %v366_v45 }
 0x14b   : > { %v430_v46 = vpop.xlane.xlu1 %429 }
 0x14c   : > { %v556_v48 = vsel %vm554_vm3, %v539_v47, %v430_v46 }
 0x158   : > { %v491_v10 = vpop.xlane.xlu0 %490 }
 0x159   : > { %v572_v31 = vsel %vm571_vm4, %v555_v33, %v491_v10 }
 0x15a   : > { %588 = vxpose.xlu1.b32.start [1/16] (narrow) %v572_v31, 8 }
 0x15c   : > { %v494_v17 = vpop.xlane.xlu1 %493  ;;  %v369_v51 = vpop.xlane.xlu0 %368 }
 0x15d   : > { %v573_v2 = vsel %vm571_vm4, %v556_v48, %v494_v17  ;;  %v540_v55 = vsel %vm537_vm2, %v1080_v49, %v369_v51 }
 0x15e   : > { %589 = vxpose.xlu1.b32.cont [2/16] (narrow) %v573_v2, 8 }
 0x160   : > { %v372_v50 = vpop.xlane.xlu1 %371  ;;  %v433_v52 = vpop.xlane.xlu0 %432 }
 0x161   : > { %v557_v9 = vsel %vm554_vm3, %v540_v55, %v433_v52  ;;  %v541_v61 = vsel %vm537_vm2, %v1086_v53, %v372_v50 }
 0x164   : > { %v436_v56 = vpop.xlane.xlu1 %435  ;;  %v497_v6 = vpop.xlane.xlu0 %496 }
 0x165   : > { %v574_v54 = vsel %vm571_vm4, %v557_v9, %v497_v6  ;;  %v558_v0 = vsel %vm554_vm3, %v541_v61, %v436_v56 }
 0x166   : > { %590 = vxpose.xlu1.b32.cont [3/16] (narrow) %v574_v54, 8 }
 0x168   : > { %v500_v4 = vpop.xlane.xlu1 %499  ;;  %v375_v22 = vpop.xlane.xlu0 %374 }
 0x169   : > { %v575_v5 = vsel %vm571_vm4, %v558_v0, %v500_v4  ;;  %v542_v49 = vsel %vm537_vm2, %v1094_v58, %v375_v22 }
 0x16a   : > { %591 = vxpose.xlu1.b32.cont [4/16] (narrow) %v575_v5, 8 }
 0x16c   : > { %v378_v7 = vpop.xlane.xlu1 %377  ;;  %v439_v8 = vpop.xlane.xlu0 %438 }
 0x16d   : > { %v559_v12 = vsel %vm554_vm3, %v542_v49, %v439_v8  ;;  %v543_v53 = vsel %vm537_vm2, %v1092_v57, %v378_v7 }
 0x170   : > { %v442_v15 = vpop.xlane.xlu1 %441  ;;  %v503_v14 = vpop.xlane.xlu0 %502 }
 0x171   : > { %v576_v21 = vsel %vm571_vm4, %v559_v12, %v503_v14  ;;  %v560_v16 = vsel %vm554_vm3, %v543_v53, %v442_v15 }
 0x172   : > { %592 = vxpose.xlu1.b32.cont [5/16] (narrow) %v576_v21, 8 }
 0x174   : > { %v506_v1 = vpop.xlane.xlu1 %505  ;;  %v381_v20 = vpop.xlane.xlu0 %380 }
 0x175   : > { %v577_v23 = vsel %vm571_vm4, %v560_v16, %v506_v1  ;;  %v544_v58 = vsel %vm537_vm2, %v1098_v60, %v381_v20 }
 0x176   : > { %593 = vxpose.xlu1.b32.cont [6/16] (narrow) %v577_v23, 8 }
 0x178   : > { %v384_v27 = vpop.xlane.xlu1 %383  ;;  %v445_v13 = vpop.xlane.xlu0 %444 }
 0x179   : > { %v561_v28 = vsel %vm554_vm3, %v544_v58, %v445_v13  ;;  %v545_v57 = vsel %vm537_vm2, %v1096_v59, %v384_v27 }
 0x17c   : > { %v448_v34 = vpop.xlane.xlu1 %447  ;;  %v509_v36 = vpop.xlane.xlu0 %508 }
 0x17d   : > { %v578_v3 = vsel %vm571_vm4, %v561_v28, %v509_v36  ;;  %v562_v25 = vsel %vm554_vm3, %v545_v57, %v448_v34 }
 0x17e   : > { %594 = vxpose.xlu1.b32.cont [7/16] (narrow) %v578_v3, 8 }
 0x180   : > { %v512_v37 = vpop.xlane.xlu1 %511  ;;  %v387_v38 = vpop.xlane.xlu0 %386 }
 0x181   : > { %v579_v39 = vsel %vm571_vm4, %v562_v25, %v512_v37  ;;  %v546_v60 = vsel %vm537_vm2, %v1102_v63, %v387_v38 }
 0x182   : > { %595 = vxpose.xlu1.b32.cont [8/16] (narrow) %v579_v39, 8 }
 0x184   : > { %v390_v29 = vpop.xlane.xlu1 %389  ;;  %v451_v40 = vpop.xlane.xlu0 %450 }
 0x185   : > { %v563_v41 = vsel %vm554_vm3, %v546_v60, %v451_v40  ;;  %v547_v59 = vsel %vm537_vm2, %v1100_v62, %v390_v29 }
 0x188   : > { %v454_v42 = vpop.xlane.xlu1 %453  ;;  %v515_v43 = vpop.xlane.xlu0 %514 }
 0x189   : > { %v580_v18 = vsel %vm571_vm4, %v563_v41, %v515_v43  ;;  %v564_v44 = vsel %vm554_vm3, %v547_v59, %v454_v42 }
 0x18a   : > { %596 = vxpose.xlu1.b32.cont [9/16] (narrow) %v580_v18, 8 }
 0x18c   : > { %v518_v45 = vpop.xlane.xlu1 %517  ;;  %v393_v26 = vpop.xlane.xlu0 %392 }
 0x18d   : > { %v581_v33 = vsel %vm571_vm4, %v564_v44, %v518_v45  ;;  %v548_v63 = vsel %vm537_vm2, %v1113_v19, %v393_v26 }
 0x18e   : > { %597 = vxpose.xlu1.b32.cont [10/16] (narrow) %v581_v33, 8 }
 0x190   : > { %v396_v46 = vpop.xlane.xlu1 %395  ;;  %v457_v10 = vpop.xlane.xlu0 %456 }
 0x191   : > { %v565_v47 = vsel %vm554_vm3, %v548_v63, %v457_v10  ;;  %v549_v62 = vsel %vm537_vm2, %v1108_v11, %v396_v46 }
 0x194   : > { %v460_v31 = vpop.xlane.xlu1 %459  ;;  %v521_v48 = vpop.xlane.xlu0 %520 }
 0x195   : > { %v582_v17 = vsel %vm571_vm4, %v565_v47, %v521_v48  ;;  %v566_v51 = vsel %vm554_vm3, %v549_v62, %v460_v31 }
 0x196   : > { %598 = vxpose.xlu1.b32.cont [11/16] (narrow) %v582_v17, 8 }
 0x198   : > { %v524_v2 = vpop.xlane.xlu1 %523  ;;  %v399_v50 = vpop.xlane.xlu0 %398 }
 0x199   : > { %v583_v52 = vsel %vm571_vm4, %v566_v51, %v524_v2  ;;  %v550_v19 = vsel %vm537_vm2, %v1116_v24, %v399_v50 }
 0x19a   : > { %599 = vxpose.xlu1.b32.cont [12/16] (narrow) %v583_v52, 8 }
 0x19c   : > { %v402_v55 = vpop.xlane.xlu1 %401  ;;  %v463_v9 = vpop.xlane.xlu0 %462 }
 0x19d   : > { %v567_v56 = vsel %vm554_vm3, %v550_v19, %v463_v9  ;;  %v551_v11 = vsel %vm537_vm2, %v1120_v32, %v402_v55 }
 0x1a0   : > { %v466_v6 = vpop.xlane.xlu1 %465  ;;  %v527_v54 = vpop.xlane.xlu0 %526 }
 0x1a1   : > { %v584_v61 = vsel %vm571_vm4, %v567_v56, %v527_v54  ;;  %v568_v0 = vsel %vm554_vm3, %v551_v11, %v466_v6 }
 0x1a2   : > { %600 = vxpose.xlu1.b32.cont [13/16] (narrow) %v584_v61, 8 }
 0x1a4   : > { %v530_v4 = vpop.xlane.xlu1 %529  ;;  %v405_v22 = vpop.xlane.xlu0 %404 }
 0x1a5   : > { %v585_v5 = vsel %vm571_vm4, %v568_v0, %v530_v4  ;;  %v552_v24 = vsel %vm537_vm2, %v1118_v30, %v405_v22 }
 0x1a6   : > { %601 = vxpose.xlu1.b32.cont [14/16] (narrow) %v585_v5, 8 }
 0x1a8   : > { %v408_v7 = vpop.xlane.xlu1 %407  ;;  %v469_v8 = vpop.xlane.xlu0 %468 }
 0x1a9   : > { %v569_v49 = vsel %vm554_vm3, %v552_v24, %v469_v8  ;;  %v553_v32 = vsel %vm537_vm2, %v1126_v35, %v408_v7 }
 0x1ac   : > { %v533_v12 = vpop.xlane.xlu0 %532  ;;  %v472_v15 = vpop.xlane.xlu1 %471 }
 0x1ad   : > { %v586_v14 = vsel %vm571_vm4, %v569_v49, %v533_v12  ;;  %v570_v21 = vsel %vm554_vm3, %v553_v32, %v472_v15 }
 0x1ae   : > { %602 = vxpose.xlu1.b32.cont [15/16] (narrow) %v586_v14, 8 }
 0x1b0   : > { %v536_v53 = vpop.xlane.xlu0 %535 }
 0x1b1   : > { %v587_v16 = vsel %vm571_vm4, %v570_v21, %v536_v53 }
 0x1b2   : > { %603 = vxpose.xlu1.b32.end [16/16] (narrow) %v587_v16, 8 }
 0x1f6   : > { %v604_v1 = vpop.trf.xlu1 }
 0x1f7   : > { %831 = vlog2.f32 %v604_v1  ;;  %v623_v23 = vrot.slane %v604_v1, 7  ;;  %v635_v27 = vmul.f32 %v604_v1, %v604_v1  ;;  %v626_v29 = vrot.slane %v604_v1, 2 }
 0x1f9   : > { %v637_v28 = vrot.slane %v635_v27, 7 }
 0x1fb   : > { %833 = vrcp.f32 %v637_v28 }
 0x201   : > { %v832_v20 = vpop.eup %831 }
 0x202   : > { %v621_v30 = vmul.f32 0.6931472, %v832_v20 }
 0x204   : > { %v625_v13 = vadd.f32 %v623_v23, %v621_v30 }
 0x205   : > { %v834_v35 = vpop.eup %833 }
 0x206   : > { %v630_v58 = vrot.slane %v625_v13, 6  ;;  %v640_v25 = vmul.f32 %v834_v35, %v604_v1  ;;  %v628_v60 = vsub.f32 %v625_v13, %v626_v29 }
 0x208   : > { %v632_v34 = vsub.f32 %v604_v1, %v630_v58  ;;  %v651_v43 = vrot.slane %v628_v60, 1 }
 0x20a   : > { %v633_v36 = vmul.f32 1.442695, %v632_v34 }
 0x20c   : > { %835 = vpow2.f32 %v633_v36 }
 0x216   : > { %v836_v3 = vpop.eup %835 }
 0x217   : > { %v641_v57 = vmul.f32 2.0, %v836_v3 }
 0x219   : > { %v643_v37 = vrot.slane %v641_v57, 1 }
 0x21b   : > { %v645_v38 = vsub.f32 %v640_v25, %v643_v37 }
 0x21d   : > { %v646_v39 = vadd.f32 1.0, %v645_v38 }
 0x21f   : > { %v647_v40 = vmul.f32 9.765625e-06, %v646_v39 }
 0x221   : > { %v648_v41 = vadd.f32 0.1, %v647_v40 }
 0x223   : > { %v649_v42 = vmul.f32 5.0, %v648_v41 }
 0x225   : > { %v654_v18 = vrot.slane %v649_v42, 1 }
 0x227   : > { %v657_v59 = vsel %vm656_vm0, %v651_v43, %v654_v18 }
 0x228   : > { %658 = vst [vmem:[%s153_s4] sm:$0x3] %v657_v59 }
 0x229   : > { %850 = shalt.err (!%p847_p3)
}
 0x22a   : > { %s851_s22 = scalar_lea.hbm %s1295_s8, 32  ;;  %s855_s25 = scalar_lea.hbm %s1339_s2, 96 }
 0x22b   : > { %p852_p4 = scmp.ne.s32.totalorder %s1295_s8, %s851_s22  ;;  %p856_p9 = scmp.lt.u32.totalorder %s1295_s8, %s1339_s2 }
 0x22c   : > { %p857_p10 = scmp.lt.u32.totalorder %s855_s25, %s851_s22  ;;  %p859_p12 = scmp.lt.u32.totalorder %s851_s22, %s1295_s8 }
 0x22d   : > { %p853_p7 = pnand %p852_p4, %p956_p5 }
 0x22e   : > { %p858_p11 = por %p857_p10, %p856_p9 }
 0x22f   : > { %p854_p8 = pneg %p853_p7 }
 0x230   : > { %p860_p13 = por %p859_p12, %p858_p11 }
 0x232   : > { %p861_p0 = pnand %p860_p13, %p854_p8 }
 0x234   : > { %864 = shalt.err (!%p861_p0)
}
 0x235   : > { %757 = dma.vmem_to_hbm [thread:$0]  (%p956_p5), %s1297_s5, 32, %s1295_s8, %s660_s14  }
 0x236 PF: > { %p763_p1 = scmp.ge.s32.totalorder %s899_s12, 2  ;;  %s685_s28 = sand.u32 1, %s887_s9  }
 0x237   : > { %s686_s29 = scalar_lea.sflag [#allocation3], %s685_s28 }
 0x238   : > { %p760_p2 = pnand %p763_p1, %p960_p6 }
 0x23a   : > { %882 = dma.done.wait (!%p760_p2), %s686_s29, 32  }
 0x23b   : > { %884 = vsyncadd (!%p760_p2), %s686_s29, 4294967264  ;;  %p12_p3 = scmp.ge.s32.totalorder %s943_s15, 5   ;;  %s1342_s9 = smov %s891_s10 }
 0x23c   : > { %s1343_s10 = smov %s895_s11  ;;  %s1344_s11 = smov %s954_s18 }
 0x23d   : > { %s1345_s12 = smov %s943_s15  ;;  %14 = sbr.rel (!%p12_p3) target bundleno = 3 (0x3), region = 66 }
 0x244   :  { %691 = vsyncpa [#allocation3], 1 }
 0x245   :  { %693 = vsyncpa [#allocation3 + $0x1], 1 }

</bundles_post_ra>
